<compile_context>
chip_gen: v7x
topology: tpu7x:2x2x1
jax: 0.10.0
libtpu: 0.0.40
codegen_flags: <defaults>
</compile_context>

<pallas_src>
import functools
import math

import jax
import jax.numpy as jnp
from jax.experimental import pallas as pl
from jax.experimental.pallas import tpu as pltpu


def _round_up(a, m):
    return ((a + m - 1) // m) * m


def _affine_kernel(w_ref, b_ref, x_ref, o_ref):
    # x_ref: (TN, S) feature tile; w_ref/b_ref: (TN, 1) per-row params
    # (broadcast along the lane axis). Compute in f32, cast to output dtype.
    x = x_ref[...].astype(jnp.float32)
    o_ref[...] = (x * w_ref[...] + b_ref[...]).astype(o_ref.dtype)


@functools.partial(jax.jit, static_argnames=("target_block_bytes",))
def affine_channel3d(x, weight, bias, *, target_block_bytes=2 * 1024 * 1024):
    """y = x * weight[None,:,None,None,None] + bias[None,:,None,None,None]."""
    B, C, D, H, W = x.shape
    S = D * H * W
    rows = B * C
    itemsize = jnp.dtype(x.dtype).itemsize

    # --- tile sizing: ~target_block_bytes per feature block, rows mult. of 8 ---
    rows8 = _round_up(rows, 8)
    rows_per_block = max(8, (target_block_bytes // max(1, S * itemsize)) // 8 * 8)
    grid = max(1, math.ceil(rows8 / rows_per_block))
    tn = _round_up(math.ceil(rows8 / grid), 8)
    rows_padded = tn * grid

    # --- flatten to lane-dense [rows, S]; per-row params; pad ragged rows ---
    xf = x.reshape(rows, S)
    w_rows = jnp.tile(weight.astype(jnp.float32), B)  # row r -> weight[r % C]
    b_rows = jnp.tile(bias.astype(jnp.float32), B)
    pad = rows_padded - rows
    if pad:
        xf = jnp.pad(xf, ((0, pad), (0, 0)))
        w_rows = jnp.pad(w_rows, (0, pad))
        b_rows = jnp.pad(b_rows, (0, pad))
    w_rows = w_rows.reshape(rows_padded, 1)
    b_rows = b_rows.reshape(rows_padded, 1)

    out = pl.pallas_call(
        _affine_kernel,
        out_shape=jax.ShapeDtypeStruct((rows_padded, S), x.dtype),
        grid_spec=pltpu.PrefetchScalarGridSpec(
            num_scalar_prefetch=0,
            grid=(grid,),
            in_specs=[
                pl.BlockSpec((tn, 1), lambda i: (i, 0)),  # per-row weight
                pl.BlockSpec((tn, 1), lambda i: (i, 0)),  # per-row bias
                pl.BlockSpec((tn, S), lambda i: (i, 0)),  # features tile
            ],
            out_specs=pl.BlockSpec((tn, S), lambda i: (i, 0)),
        ),
        input_output_aliases={2: 0},  # in-place semantics of the torch op
        compiler_params=pltpu.CompilerParams(
            dimension_semantics=("parallel",),
            vmem_limit_bytes=32 * 1024 * 1024,
        ),
    )(w_rows, b_rows, xf)

    return out[:rows].reshape(B, C, D, H, W)


class AffineChannel3dJAX:
    """Mirror of the PyTorch module: weight ~ U[0,1), bias = 0."""

    def __init__(self, num_features, key):
        self.num_features = num_features
        self.weight = jax.random.uniform(key, (num_features,), dtype=jnp.float32)
        self.bias = jnp.zeros((num_features,), dtype=jnp.float32)

    def __call__(self, x):
        return affine_channel3d(x, self.weight, self.bias)


if __name__ == "__main__":
    key = jax.random.PRNGKey(0)
    k_param, k_feat = jax.random.split(key)

    B, C, D, H, W = 2, 4, 16, 16, 16
    module = AffineChannel3dJAX(C, k_param)
    x = jax.random.normal(k_feat, (B, C, D, H, W), dtype=jnp.float32)

    out = jax.block_until_ready(module(x))

    # Reference check in plain JAX (matches the PyTorch forward).
    ref = x * module.weight.reshape(1, C, 1, 1, 1) + module.bias.reshape(1, C, 1, 1, 1)
    assert out.shape == x.shape
    assert jnp.allclose(out, ref, atol=1e-6), "mismatch vs reference"

    print("KERNEL_OK")
</pallas_src>

<mosaic_0001>
module attributes {stable_mosaic.version = 11 : i64} {
  func.func @_affine_kernel(%arg0: i32, %arg1: memref<8x1xf32, #tpu.memory_space<vmem>>, %arg2: memref<8x1xf32, #tpu.memory_space<vmem>>, %arg3: memref<8x4096xf32, #tpu.memory_space<vmem>>, %arg4: memref<8x4096xf32, #tpu.memory_space<vmem>>) attributes {dimension_semantics = [#tpu.dimension_semantics<parallel>], iteration_bounds = array<i64: 1>, scalar_prefetch = 0 : i64, scratch_operands = 0 : i64, tpu.core_type = #tpu.core_type<tc>, window_params = [{transform_indices = @transform_0, window_bounds = array<i64: 8, 1>}, {transform_indices = @transform_1, window_bounds = array<i64: 8, 1>}, {transform_indices = @transform_2, window_bounds = array<i64: 8, 4096>}, {transform_indices = @transform_3, window_bounds = array<i64: 8, 4096>}]} {
    %c0 = arith.constant 0 : index
    %c0_0 = arith.constant 0 : index
    %0 = vector.load %arg3[%c0, %c0_0] : memref<8x4096xf32, #tpu.memory_space<vmem>>, vector<8x4096xf32>
    %c0_1 = arith.constant 0 : index
    %c0_2 = arith.constant 0 : index
    %1 = vector.load %arg1[%c0_1, %c0_2] : memref<8x1xf32, #tpu.memory_space<vmem>>, vector<8x1xf32>
    %2 = vector.broadcast %1 : vector<8x1xf32> to vector<8x4096xf32>
    %3 = arith.mulf %0, %2 : vector<8x4096xf32>
    %c0_3 = arith.constant 0 : index
    %c0_4 = arith.constant 0 : index
    %4 = vector.load %arg2[%c0_3, %c0_4] : memref<8x1xf32, #tpu.memory_space<vmem>>, vector<8x1xf32>
    %5 = vector.broadcast %4 : vector<8x1xf32> to vector<8x4096xf32>
    %6 = arith.addf %3, %5 : vector<8x4096xf32>
    %c0_5 = arith.constant 0 : index
    %c0_6 = arith.constant 0 : index
    %7 = vector.load %arg4[%c0_5, %c0_6] : memref<8x4096xf32, #tpu.memory_space<vmem>>, vector<8x4096xf32>
    tpu.vector_store %arg4[%c0_5, %c0_6], %6 {strides = array<i32>} : memref<8x4096xf32, #tpu.memory_space<vmem>>, vector<8x4096xf32>,
    return
  }
  func.func @transform_0(%arg0: i32) -> (i32, i32) {
    %c0_i32 = arith.constant 0 : i32
    %c0_i32_0 = arith.constant 0 : i32
    return %arg0, %c0_i32 : i32, i32
  }
  func.func @transform_1(%arg0: i32) -> (i32, i32) {
    %c0_i32 = arith.constant 0 : i32
    %c0_i32_0 = arith.constant 0 : i32
    return %arg0, %c0_i32 : i32, i32
  }
  func.func @transform_2(%arg0: i32) -> (i32, i32) {
    %c0_i32 = arith.constant 0 : i32
    %c0_i32_0 = arith.constant 0 : i32
    return %arg0, %c0_i32 : i32, i32
  }
  func.func @transform_3(%arg0: i32) -> (i32, i32) {
    %c0_i32 = arith.constant 0 : i32
    %c0_i32_0 = arith.constant 0 : i32
    return %arg0, %c0_i32 : i32, i32
  }
}

</mosaic_0001>

<bundles_post_ra>
// kernel: tile.1
= control target key start
LH: loop header
LB: loop body
LE: loop exit
PB: predicated region body
PF: predicated region fallthrough
CT: control target
= control target key end

     0   :  { %s34_s8 = smov 125   ;;  %vm7_vm0 = vcmask 7168   ;;  %s35_s11 = smov 126   ;;  %s61_s0 = inlined_call_operand.vmem [shape: f32[2,4], index: 0, kind: input, shape index: {}]   ;;  %s62_s1 = inlined_call_operand.vmem [shape: f32[8,1], index: 1, kind: output, shape index: {}]  }
   0x1   :  { %v4_v0 = vld [vmem:[%s61_s0] sm:$0x3]  ;;  %s33_s0 = smov 127  }
   0x2   :  { %5 = vst [vmem:[#allocation0] sm:$0x3] %v4_v0 }
   0x9   :  { %v9_v1 = vld [vmem:[#allocation0] sm:$0x3]  }
   0xa   :  { %v21_v2 = vld [vmem:[#allocation0] sm:$0x3]   ;;  %10 = vrot.lane.b32.xlu0 %v9_v1, %s33_s0 }
   0xb   :  { %22 = vrot.lane.b32.xlu1 %v21_v2, %s34_s8  ;;  %v6_v3 = vld [vmem:[#allocation0] sm:$0x3]  }
   0xc   :  { %v15_v4 = vld [vmem:[#allocation0] sm:$0x3]   ;;  %8 = vst.msk [vmem:[%s62_s1] ss:$4 sm:$0x3] %vm7_vm0, %v6_v3  }
   0xe   :  { %16 = vrot.lane.b32.xlu0 %v15_v4, %s35_s11 }
  0x7c   :  { %v11_v5 = vpop.permute.xlu0 %10  }
  0x7d   :  { %v23_v6 = vpop.permute.xlu1 %22   ;;  %27 = vst.msk [vmem:[%s62_s1 + $0x1] ss:$4 sm:$0x3] %vm7_vm0, %v11_v5  }
  0x7e   :  { %29 = vst.msk [vmem:[%s62_s1 + $0x3] ss:$4 sm:$0x3] %vm7_vm0, %v23_v6  }
  0x80   :  { %v17_v7 = vpop.permute.xlu0 %16  }
  0x81   :  { %28 = vst.msk [vmem:[%s62_s1 + $0x2] ss:$4 sm:$0x3] %vm7_vm0, %v17_v7  }

// kernel: tile.13
= control target key start
LH: loop header
LB: loop body
LE: loop exit
PB: predicated region body
PF: predicated region fallthrough
CT: control target
= control target key end

     0   :  { %s22_s0 = inlined_call_operand.vmem [shape: f32[4], index: 0, kind: input, shape index: {}]   ;;  %s23_s1 = inlined_call_operand.vmem [shape: f32[2,4], index: 1, kind: output, shape index: {}]  }
   0x1   :  { %v4_v0 = vld [vmem:[%s22_s0] ss:$0 sm:$0xff] }
   0x2   :  { %5 = vst [vmem:[%s23_s1] sm:$0x3] %v4_v0 }

// kernel: affine_channel3d.1
= control target key start
LH: loop header
LB: loop body
LE: loop exit
PB: predicated region body
PF: predicated region fallthrough
CT: control target
= control target key end

     0   :  { %v160_v0 = vmov 0   ;;  %s379_s0 = inlined_call_operand.vmem [shape: f32[8,1], index: 0, kind: input, shape index: {}]   ;;  %s380_s1 = inlined_call_operand.vmem [shape: f32[8,1], index: 1, kind: input, shape index: {}]   ;;  %s381_s2 = inlined_call_operand.vmem [shape: f32[8,4096], index: 2, kind: input, shape index: {}, may-alias: {2,3}]   ;;  %s382_s3 = inlined_call_operand.vmem [shape: f32[8,4096], index: 3, kind: output, shape index: {}, may-alias: {2,3}]  }
   0x1   :  { %159 = vset.pattern.permute.xlu0 %v160_v0  ;;  %v46_v1 = vld [vmem:[%s379_s0] sm:$0xff]  ;;  %v15_v4 = vld [vmem:[%s381_s2 + $0x8] sm:$0xff]  ;;  %v16_v5 = vld [vmem:[%s381_s2 + $0x10] sm:$0xff] }
   0x2   :  { %49 = vperm.xlu0 %159, %v46_v1   ;;  %v84_v2 = vld [vmem:[%s380_s1] sm:$0xff]  ;;  %v17_v6 = vld [vmem:[%s381_s2 + $0x18] sm:$0xff]  ;;  %v19_v8 = vld [vmem:[%s381_s2 + $0x28] sm:$0xff] }
   0x3   :  { %v14_v3 = vld [vmem:[%s381_s2] sm:$0xff]  ;;  %v20_v9 = vld [vmem:[%s381_s2 + $0x30] sm:$0xff]  ;;  %v21_v10 = vld [vmem:[%s381_s2 + $0x38] sm:$0xff] }
   0x4   :  { %v18_v7 = vld [vmem:[%s381_s2 + $0x20] sm:$0xff]  ;;  %v23_v12 = vld [vmem:[%s381_s2 + $0x48] sm:$0xff]  ;;  %v24_v13 = vld [vmem:[%s381_s2 + $0x50] sm:$0xff] }
   0x5   :  { %v22_v11 = vld [vmem:[%s381_s2 + $0x40] sm:$0xff]  ;;  %v25_v14 = vld [vmem:[%s381_s2 + $0x58] sm:$0xff]  ;;  %v27_v16 = vld [vmem:[%s381_s2 + $0x68] sm:$0xff] }
   0x6   :  { %87 = vperm.xlu0 %159, %v84_v2   ;;  %v26_v15 = vld [vmem:[%s381_s2 + $0x60] sm:$0xff]  ;;  %v28_v18 = vld [vmem:[%s381_s2 + $0x70] sm:$0xff]  ;;  %v29_v19 = vld [vmem:[%s381_s2 + $0x78] sm:$0xff] }
   0x7   :  { %v30_v20 = vld [vmem:[%s381_s2 + $0x80] sm:$0xff]  ;;  %v31_v21 = vld [vmem:[%s381_s2 + $0x88] sm:$0xff]  ;;  %v32_v22 = vld [vmem:[%s381_s2 + $0x90] sm:$0xff] }
   0x8   :  { %v33_v23 = vld [vmem:[%s381_s2 + $0x98] sm:$0xff]  ;;  %v34_v28 = vld [vmem:[%s381_s2 + $0xa0] sm:$0xff]  ;;  %v35_v29 = vld [vmem:[%s381_s2 + $0xa8] sm:$0xff] }
   0x9   :  { %v36_v30 = vld [vmem:[%s381_s2 + $0xb0] sm:$0xff]  ;;  %v37_v35 = vld [vmem:[%s381_s2 + $0xb8] sm:$0xff]  ;;  %v38_v36 = vld [vmem:[%s381_s2 + $0xc0] sm:$0xff] }
   0xa   :  { %v39_v37 = vld [vmem:[%s381_s2 + $0xc8] sm:$0xff]  ;;  %v40_v42 = vld [vmem:[%s381_s2 + $0xd0] sm:$0xff]  ;;  %v41_v43 = vld [vmem:[%s381_s2 + $0xd8] sm:$0xff] }
   0xb   :  { %v42_v44 = vld [vmem:[%s381_s2 + $0xe0] sm:$0xff]  ;;  %v43_v49 = vld [vmem:[%s381_s2 + $0xe8] sm:$0xff]  ;;  %v44_v50 = vld [vmem:[%s381_s2 + $0xf0] sm:$0xff] }
   0xc   :  { %v45_v51 = vld [vmem:[%s381_s2 + $0xf8] sm:$0xff] }
  0x81   :  { %v50_v17 = vpop.permute.xlu0 %49 }
  0x82   :  { %v52_v24 = vmul.f32 %v50_v17, %v14_v3  ;;  %v53_v25 = vmul.f32 %v50_v17, %v15_v4  ;;  %v54_v26 = vmul.f32 %v50_v17, %v16_v5  ;;  %v55_v27 = vmul.f32 %v50_v17, %v17_v6 }
  0x83   :  { %v56_v31 = vmul.f32 %v50_v17, %v18_v7  ;;  %v57_v32 = vmul.f32 %v50_v17, %v19_v8  ;;  %v58_v33 = vmul.f32 %v50_v17, %v20_v9  ;;  %v59_v34 = vmul.f32 %v50_v17, %v21_v10 }
  0x84   :  { %v60_v38 = vmul.f32 %v50_v17, %v22_v11  ;;  %v61_v39 = vmul.f32 %v50_v17, %v23_v12  ;;  %v62_v40 = vmul.f32 %v50_v17, %v24_v13  ;;  %v63_v41 = vmul.f32 %v50_v17, %v25_v14 }
  0x85   :  { %v64_v45 = vmul.f32 %v50_v17, %v26_v15  ;;  %v65_v46 = vmul.f32 %v50_v17, %v27_v16  ;;  %v66_v47 = vmul.f32 %v50_v17, %v28_v18  ;;  %v67_v48 = vmul.f32 %v50_v17, %v29_v19  ;;  %v88_v60 = vpop.permute.xlu0 %87 }
  0x86   :  { %v68_v52 = vmul.f32 %v50_v17, %v30_v20  ;;  %v69_v53 = vmul.f32 %v50_v17, %v31_v21  ;;  %v70_v54 = vmul.f32 %v50_v17, %v32_v22  ;;  %v71_v55 = vmul.f32 %v50_v17, %v33_v23 }
  0x87   :  { %v72_v56 = vmul.f32 %v50_v17, %v34_v28  ;;  %v73_v57 = vmul.f32 %v50_v17, %v35_v29  ;;  %v74_v58 = vmul.f32 %v50_v17, %v36_v30  ;;  %v75_v59 = vmul.f32 %v50_v17, %v37_v35 }
  0x88   :  { %v76_v61 = vmul.f32 %v50_v17, %v38_v36  ;;  %v77_v62 = vmul.f32 %v50_v17, %v39_v37  ;;  %v78_v63 = vmul.f32 %v50_v17, %v40_v42  ;;  %v79_v0 = vmul.f32 %v50_v17, %v41_v43 }
  0x89   :  { %v80_v1 = vmul.f32 %v50_v17, %v42_v44  ;;  %v81_v2 = vmul.f32 %v50_v17, %v43_v49  ;;  %v82_v3 = vmul.f32 %v50_v17, %v44_v50  ;;  %v83_v4 = vmul.f32 %v50_v17, %v45_v51 }
  0x8a   :  { %v90_v5 = vadd.f32 %v88_v60, %v52_v24  ;;  %v91_v6 = vadd.f32 %v88_v60, %v53_v25  ;;  %v92_v7 = vadd.f32 %v88_v60, %v54_v26  ;;  %v93_v8 = vadd.f32 %v88_v60, %v55_v27 }
  0x8b   :  { %v94_v9 = vadd.f32 %v88_v60, %v56_v31  ;;  %v95_v10 = vadd.f32 %v88_v60, %v57_v32  ;;  %v96_v11 = vadd.f32 %v88_v60, %v58_v33  ;;  %v97_v12 = vadd.f32 %v88_v60, %v59_v34 }
  0x8c   :  { %v98_v13 = vadd.f32 %v88_v60, %v60_v38  ;;  %v99_v14 = vadd.f32 %v88_v60, %v61_v39  ;;  %v100_v15 = vadd.f32 %v88_v60, %v62_v40  ;;  %v101_v16 = vadd.f32 %v88_v60, %v63_v41  ;;  %122 = vst [vmem:[%s382_s3] sm:$0xff] %v90_v5 }
  0x8d   :  { %123 = vst [vmem:[%s382_s3 + $0x8] sm:$0xff] %v91_v6  ;;  %124 = vst [vmem:[%s382_s3 + $0x10] sm:$0xff] %v92_v7  ;;  %v102_v17 = vadd.f32 %v88_v60, %v64_v45  ;;  %v103_v18 = vadd.f32 %v88_v60, %v65_v46  ;;  %v104_v19 = vadd.f32 %v88_v60, %v66_v47 }
  0x8e   :  { %125 = vst [vmem:[%s382_s3 + $0x18] sm:$0xff] %v93_v8  ;;  %v105_v20 = vadd.f32 %v88_v60, %v67_v48  ;;  %126 = vst [vmem:[%s382_s3 + $0x20] sm:$0xff] %v94_v9  ;;  %v106_v21 = vadd.f32 %v88_v60, %v68_v52  ;;  %v107_v22 = vadd.f32 %v88_v60, %v69_v53 }
  0x8f   :  { %127 = vst [vmem:[%s382_s3 + $0x28] sm:$0xff] %v95_v10  ;;  %128 = vst [vmem:[%s382_s3 + $0x30] sm:$0xff] %v96_v11  ;;  %v108_v23 = vadd.f32 %v88_v60, %v70_v54  ;;  %v109_v24 = vadd.f32 %v88_v60, %v71_v55  ;;  %v110_v25 = vadd.f32 %v88_v60, %v72_v56 }
  0x90   :  { %129 = vst [vmem:[%s382_s3 + $0x38] sm:$0xff] %v97_v12  ;;  %130 = vst [vmem:[%s382_s3 + $0x40] sm:$0xff] %v98_v13  ;;  %v111_v26 = vadd.f32 %v88_v60, %v73_v57  ;;  %v112_v27 = vadd.f32 %v88_v60, %v74_v58  ;;  %v113_v28 = vadd.f32 %v88_v60, %v75_v59 }
  0x91   :  { %131 = vst [vmem:[%s382_s3 + $0x48] sm:$0xff] %v99_v14  ;;  %132 = vst [vmem:[%s382_s3 + $0x50] sm:$0xff] %v100_v15  ;;  %v114_v29 = vadd.f32 %v88_v60, %v76_v61  ;;  %v115_v30 = vadd.f32 %v88_v60, %v77_v62  ;;  %v116_v31 = vadd.f32 %v88_v60, %v78_v63 }
  0x92   :  { %133 = vst [vmem:[%s382_s3 + $0x58] sm:$0xff] %v101_v16  ;;  %134 = vst [vmem:[%s382_s3 + $0x60] sm:$0xff] %v102_v17  ;;  %v117_v32 = vadd.f32 %v88_v60, %v79_v0  ;;  %v118_v33 = vadd.f32 %v88_v60, %v80_v1  ;;  %v119_v34 = vadd.f32 %v88_v60, %v81_v2 }
  0x93   :  { %135 = vst [vmem:[%s382_s3 + $0x68] sm:$0xff] %v103_v18  ;;  %136 = vst [vmem:[%s382_s3 + $0x70] sm:$0xff] %v104_v19  ;;  %v120_v35 = vadd.f32 %v88_v60, %v82_v3  ;;  %v121_v36 = vadd.f32 %v88_v60, %v83_v4 }
  0x94   :  { %137 = vst [vmem:[%s382_s3 + $0x78] sm:$0xff] %v105_v20  ;;  %138 = vst [vmem:[%s382_s3 + $0x80] sm:$0xff] %v106_v21 }
  0x95   :  { %139 = vst [vmem:[%s382_s3 + $0x88] sm:$0xff] %v107_v22  ;;  %140 = vst [vmem:[%s382_s3 + $0x90] sm:$0xff] %v108_v23 }
  0x96   :  { %141 = vst [vmem:[%s382_s3 + $0x98] sm:$0xff] %v109_v24  ;;  %142 = vst [vmem:[%s382_s3 + $0xa0] sm:$0xff] %v110_v25 }
  0x97   :  { %143 = vst [vmem:[%s382_s3 + $0xa8] sm:$0xff] %v111_v26  ;;  %144 = vst [vmem:[%s382_s3 + $0xb0] sm:$0xff] %v112_v27 }
  0x98   :  { %145 = vst [vmem:[%s382_s3 + $0xb8] sm:$0xff] %v113_v28  ;;  %146 = vst [vmem:[%s382_s3 + $0xc0] sm:$0xff] %v114_v29 }
  0x99   :  { %147 = vst [vmem:[%s382_s3 + $0xc8] sm:$0xff] %v115_v30  ;;  %148 = vst [vmem:[%s382_s3 + $0xd0] sm:$0xff] %v116_v31 }
  0x9a   :  { %149 = vst [vmem:[%s382_s3 + $0xd8] sm:$0xff] %v117_v32  ;;  %150 = vst [vmem:[%s382_s3 + $0xe0] sm:$0xff] %v118_v33 }
  0x9b   :  { %151 = vst [vmem:[%s382_s3 + $0xe8] sm:$0xff] %v119_v34  ;;  %152 = vst [vmem:[%s382_s3 + $0xf0] sm:$0xff] %v120_v35 }
  0x9c   :  { %153 = vst [vmem:[%s382_s3 + $0xf8] sm:$0xff] %v121_v36 }

</bundles_post_ra>
